<compile_context>
chip_gen: v5e
topology: v5e:2x2
jax: 0.10.0
libtpu: 0.0.40
codegen_flags: <defaults>
</compile_context>

<pallas_src>
import math

import jax
import jax.numpy as jnp
from jax.experimental import pallas as pl
from jax.experimental.pallas import tpu as pltpu

_LANE = 128  # lane width (last-dim alignment)


def _repeat_kernel(pattern_ref, out_ref):
    # pattern_ref: (1, te) slice of the lane-dense per-layer pattern row
    #              (layer dim squeezed).
    # out_ref:     (tb, te) output tile — broadcast along the row (sublane) axis.
    out_ref[...] = jnp.broadcast_to(pattern_ref[...], out_ref.shape)


def _pick_tile(dim: int, align: int, max_tile: int) -> int:
    """Legal block size along one dim: the full dim, or a multiple of `align`."""
    if dim <= max_tile:
        return dim  # full-dim block is always a legal block shape
    return max(align, (max_tile // align) * align)


def gru_state_gen(state: jax.Array, batch: int, *,
                  min_pallas_bytes: int = 8 << 20,
                  max_block_bytes: int = 4 << 20,
                  force_pallas: bool = False) -> tuple[jax.Array]:
    """Equivalent of GRUStateGen.forward(batch): (layers, 1, embed) -> (layers, batch, embed)."""
    layers, one, embed = state.shape
    assert one == 1
    dtype = state.dtype
    itemsize = jnp.dtype(dtype).itemsize
    out_bytes = layers * batch * embed * itemsize

    # Fast path: below a few MiB the pallas_call launch / first-DMA setup cost
    # dominates the whole HBM write; XLA's (fusible) broadcast hits the same
    # write roofline for free.
    if out_bytes < min_pallas_bytes and not force_pallas:
        return (jnp.broadcast_to(state, (layers, batch, embed)),)

    # Lane-dense flattening: view the output as (layers, R, C) where C is a
    # multiple of both 128 and embed, so every row is identical (state tiled
    # `period` times) and every store is an unmasked full-lane vst.
    period = _LANE // math.gcd(embed, _LANE)
    if period == 1:                       # embed already a multiple of 128
        pattern = state                   # (layers, 1, embed)
        R, C = batch, embed
    elif batch % period == 0:
        pattern = jnp.tile(state, (1, 1, period))   # (layers, 1, embed*period), tiny one-time op
        R, C = batch // period, embed * period
    else:
        # No exact lane-dense factorization; the XLA broadcast is equally
        # write-roofline-bound, so don't fight masked stores.
        return (jnp.broadcast_to(state, (layers, batch, embed)),)

    # dtype-dependent sublane alignment: 8 (f32) / 16 (bf16) / 32 (int8/fp8).
    sub_align = 8 * max(1, 4 // itemsize)

    # Block budget, clamped so a user-raised value stays v7x-safe (64 MiB VMEM).
    budget = int(min(max_block_bytes, 16 << 20))
    row_bytes = C * itemsize
    if row_bytes * sub_align <= budget:
        # Full contiguous row per writeback DMA; grow tb up to the budget.
        te = C
        tb = _pick_tile(R, sub_align, max(sub_align, budget // row_bytes))
    else:
        # Row too wide for the budget: minimal aligned tb, tile the lane axis.
        tb = R if R <= sub_align else sub_align
        te = _pick_tile(C, _LANE, max(_LANE, budget // (tb * itemsize)))

    nb = pl.cdiv(R, tb)
    ne = pl.cdiv(C, te)

    # Grid ordering: largest parallel axis leading (balanced megacore split on
    # v7x even when layers == 1); batch-tile axis innermost otherwise so the
    # small (1, te) pattern slice is not re-DMA'd between consecutive steps.
    extents = {"l": layers, "b": nb, "e": ne}
    lead = max(extents, key=extents.get)
    if lead == "b":
        rest = sorted(["l", "e"], key=extents.get, reverse=True)
    else:
        rest = [k for k in ("l", "e") if k != lead] + ["b"]
    order = [lead] + rest
    pos = {k: i for i, k in enumerate(order)}
    grid = tuple(extents[k] for k in order)

    def out_index(*ids):
        return (ids[pos["l"]], ids[pos["b"]], ids[pos["e"]])

    def in_index(*ids):
        return (ids[pos["l"]], 0, ids[pos["e"]])

    # Explicit VMEM request: 2 double-buffered output blocks + 2 (small) input
    # blocks + headroom.  Capped at 48 MiB so the config never starves v7x's
    # 64 MiB VMEM, and stays within v5e's 16 MiB scoped default at the default
    # 4 MiB block budget.
    block_bytes = tb * te * itemsize
    in_block_bytes = te * itemsize
    vmem_limit = int(min(48 << 20,
                         max(4 << 20,
                             2 * block_bytes + 2 * in_block_bytes + (2 << 20))))

    out2d = pl.pallas_call(
        _repeat_kernel,
        out_shape=jax.ShapeDtypeStruct((layers, R, C), dtype),
        grid=grid,
        in_specs=[
            # Layer dim squeezed; block index ignores the batch-tile axis so the
            # pattern slice is only re-fetched when (layer, embed-tile) changes.
            pl.BlockSpec((None, 1, te), in_index),
        ],
        out_specs=pl.BlockSpec((None, tb, te), out_index),
        compiler_params=pltpu.CompilerParams(
            # Every output block is written exactly once -> fully parallel grid.
            dimension_semantics=("parallel", "parallel", "parallel"),
            vmem_limit_bytes=vmem_limit,
        ),
        cost_estimate=pl.CostEstimate(
            flops=0, transcendentals=0,
            bytes_accessed=int(out_bytes + layers * C * itemsize)),
    )(pattern)

    # (layers, R, C) -> (layers, batch, embed): same contiguous buffer, free view.
    return (out2d.reshape(layers, batch, embed),)


if __name__ == "__main__":
    key = jax.random.PRNGKey(0)
    ks = jax.random.split(key, 4)

    # 1) Small module-like shapes (embed=32, layers=2, batch=8) forced through
    #    the Pallas path: embed<128 -> flattened to a lane-dense (R=2, C=128) view.
    layers, embed, batch = 2, 32, 8
    state = jax.random.uniform(ks[0], (layers, 1, embed), dtype=jnp.float32)
    (out,) = gru_state_gen(state, batch, force_pallas=True)
    out = jax.block_until_ready(out)
    ref = jnp.tile(state, (1, batch, 1))
    assert out.shape == (layers, batch, embed), out.shape
    assert jnp.array_equal(out, ref), "flattened Pallas path mismatch vs reference"

    # 2) Same shapes through the small-output fast path (XLA broadcast).
    (out_fast,) = gru_state_gen(state, batch)
    assert jnp.array_equal(jax.block_until_ready(out_fast), ref), "fast path mismatch"

    # 3) embed multiple of 128 (direct lane-dense path) with a deliberately tiny
    #    block budget so the tiled multi-axis grid is exercised (tb=8, te=128).
    layers2, embed2, batch2 = 1, 256, 32
    state2 = jax.random.uniform(ks[1], (layers2, 1, embed2), dtype=jnp.float32)
    (out2,) = gru_state_gen(state2, batch2, force_pallas=True,
                            max_block_bytes=8 * 128 * 4)
    out2 = jax.block_until_ready(out2)
    ref2 = jnp.tile(state2, (1, batch2, 1))
    assert jnp.array_equal(out2, ref2), "tiled Pallas path mismatch vs reference"

    # 4) bf16 state with embed=96 (not dividing 128): dtype-aligned sublane tile
    #    (16) plus lane-dense flattening (period=4, C=384).
    layers3, embed3, batch3 = 1, 96, 64
    state3 = jax.random.uniform(ks[2], (layers3, 1, embed3), dtype=jnp.bfloat16)
    (out3,) = gru_state_gen(state3, batch3, force_pallas=True)
    out3 = jax.block_until_ready(out3)
    ref3 = jnp.tile(state3, (1, batch3, 1))
    assert jnp.array_equal(out3, ref3), "bf16 flattened path mismatch vs reference"

    # 5) Shapes with no lane-dense factorization (batch not a multiple of the
    #    flatten period) correctly fall back to the XLA broadcast.
    state4 = jax.random.uniform(ks[3], (1, 1, 32), dtype=jnp.float32)
    (out4,) = gru_state_gen(state4, 2, force_pallas=True)
    ref4 = jnp.tile(state4, (1, 2, 1))
    assert jnp.array_equal(jax.block_until_ready(out4), ref4), "fallback mismatch"

    print("KERNEL_OK")
</pallas_src>

<mosaic_0001>
module attributes {stable_mosaic.version = 11 : i64} {
  func.func @_repeat_kernel(%arg0: i32, %arg1: i32, %arg2: i32, %arg3: memref<1x1x128xf32, #tpu.memory_space<vmem>>, %arg4: memref<1x2x128xf32, #tpu.memory_space<vmem>>) attributes {dimension_semantics = [#tpu.dimension_semantics<parallel>, #tpu.dimension_semantics<parallel>, #tpu.dimension_semantics<parallel>], iteration_bounds = array<i64: 2, 1, 1>, scalar_prefetch = 0 : i64, scratch_operands = 0 : i64, tpu.core_type = #tpu.core_type<tc>, window_params = [{transform_indices = @transform_0, window_bounds = array<i64: 1, 1, 128>}, {transform_indices = @transform_1, window_bounds = array<i64: 1, 2, 128>}]} {
    %c0 = arith.constant 0 : index
    %c0_0 = arith.constant 0 : index
    %c0_1 = arith.constant 0 : index
    %0 = vector.load %arg3[%c0, %c0_0, %c0_1] : memref<1x1x128xf32, #tpu.memory_space<vmem>>, vector<1x1x128xf32>
    %1 = vector.shape_cast %0 : vector<1x1x128xf32> to vector<1x128xf32>
    %2 = vector.shape_cast %1 : vector<1x128xf32> to vector<1x128xf32>
    %3 = vector.broadcast %2 : vector<1x128xf32> to vector<2x128xf32>
    %c0_2 = arith.constant 0 : index
    %c0_3 = arith.constant 0 : index
    %c0_4 = arith.constant 0 : index
    %4 = vector.load %arg4[%c0_2, %c0_3, %c0_4] : memref<1x2x128xf32, #tpu.memory_space<vmem>>, vector<1x2x128xf32>
    %5 = vector.shape_cast %4 : vector<1x2x128xf32> to vector<2x128xf32>
    %6 = vector.shape_cast %3 : vector<2x128xf32> to vector<1x2x128xf32>
    tpu.vector_store %arg4[%c0_2, %c0_3, %c0_4], %6 {strides = array<i32>} : memref<1x2x128xf32, #tpu.memory_space<vmem>>, vector<1x2x128xf32>,
    return
  }
  func.func @transform_0(%arg0: i32, %arg1: i32, %arg2: i32) -> (i32, i32, i32) {
    %c0_i32 = arith.constant 0 : i32
    %c0_i32_0 = arith.constant 0 : i32
    return %arg0, %c0_i32, %arg1 : i32, i32, i32
  }
  func.func @transform_1(%arg0: i32, %arg1: i32, %arg2: i32) -> (i32, i32, i32) {
    %c0_i32 = arith.constant 0 : i32
    return %arg0, %arg2, %arg1 : i32, i32, i32
  }
}

</mosaic_0001>

<bundles_post_ra>
// kernel: tpu_custom_call.1
= control target key start
LH: loop header
LB: loop body
LE: loop exit
PB: predicated region body
PF: predicated region fallthrough
CT: control target
= control target key end

     0   :  { %6 = vsyncpa [#allocation3], 0  ;;  %s577_s0 = inlined_call_operand.hbm [shape: f32[2,1,128], index: 0, kind: input, shape index: {}]   ;;  %s578_s1 = inlined_call_operand.hbm [shape: f32[2,2,128], index: 1, kind: output, shape index: {}]  }
   0x1   :  { %8 = vsyncpa [#allocation3 + $0x1], 0 }
   0x2   :  { %9 = vsyncpa [#allocation4], 0 }
   0x3   :  { %11 = vsyncpa [#allocation4 + $0x1], 0  ;;  %s456_s6 = smov 0   ;;  %s458_s7 = smov 0  }
   0x4   :  { %s460_s8 = smov 0   ;;  %s462_s9 = smov 0  }
   0x5   :  { %s464_s10 = smov 0   ;;  %s466_s11 = smov 0  }
   0x6 LB: > { %s259_s12 = sadd.s32 4294967295, %s444_s11   ;;  %s260_s13 = sadd.s32 4294967294, %s444_s11   ;;  %s444_s11 = sphi %s466_s11, %s17_s11   ;;  %s440_s10 = sphi %s464_s10, %s587_s10   ;;  %s436_s9 = sphi %s462_s9, %s586_s9   ;;  %s432_s8 = sphi %s460_s8, %s585_s8   ;;  %s428_s7 = sphi %s458_s7, %s584_s7   ;;  %s424_s6 = sphi %s456_s6, %s583_s6  }
   0x7   : > { %s36_s14 = sadd.s32 1, %s440_s10  ;;  %s45_s15 = sadd.s32 1, %s432_s8 }
   0x8   : > { %p38_p0 = scmp.ge.s32.totalorder %s36_s14, 2  ;;  %p52_p1 = scmp.ne.s32.totalorder %s432_s8, %s428_s7 }
   0x9   : > { %p53_p2 = scmp.eq.s32.totalorder %s444_s11, 0  ;;  %p58_p3 = scmp.ne.s32.totalorder %s428_s7, %s424_s6 }
   0xa   : > { %s589_s14 = smov (%p38_p0, %s36_s14), 0  ;;  %p59_p5 = scmp.eq.s32.totalorder %s259_s12, 0 }
   0xb   : > { %p497_p4 = por %p53_p2, %p52_p1  ;;  %s40_s17 = ssub.s32 %s440_s10, %s589_s14 }
   0xc   : > { %p86_p6 = scmp.eq.s32.totalorder %s259_s12, 1  ;;  %p43_p7 = scmp.eq.s32.totalorder %s40_s17, 0 }
   0xd   : > { %p503_p8 = por %p59_p5, %p58_p3  ;;  %p92_p10 = scmp.eq.s32.totalorder %s260_s13, 1 }
   0xe   : > { %p507_p9 = por %p86_p6, %p52_p1  ;;  %p262_p12 = scmp.ge.s32.totalorder %s444_s11, 2 }
   0xf   : > { %s512_s20 = scalar_select %p43_p7, %s432_s8, %s45_s15  }
  0x10   : > { %p514_p11 = por %p92_p10, %p58_p3  ;;  %p281_p13 = scmp.lt.s32.totalorder %s444_s11, 2 }
  0x11   : > { %s112_s22 = sand.u32 1, %s432_s8   ;;  %s119_s25 = scalar_lea.hbm %s577_s0, %s440_s10 }
  0x12   : > { %s115_s26 = scalar_lea.vmem [#allocation2], %s112_s22  ;;  %s121_s28 = sshll.u32 %s119_s25, 4  ;;  %s122_s28 = int_to_ptr.hbm [resolvable:$true] %s121_s28 }
  0x13   : > { %s123_s27 = sshll.u32 %s115_s26, 4  ;;  %p274_p0 = pnand %p281_p13, %p497_p4  ;;  %s124_s27 = int_to_ptr.vmem [resolvable:$true] %s123_s27 }
  0x14   : > { %p263_p1 = scmp.ge.s32.totalorder %s444_s11, 1  ;;  %p128_p2 = scmp.lt.s32.totalorder %s444_s11, 3 }
  0x15   : > { %s113_s29 = scalar_lea.sflag [#allocation3], %s112_s22 }
  0x16   : > { %276 = dma.hbm_to_vmem [thread:$0]  (!%p274_p0), %s122_s28, 16, %s124_s27, %s113_s29  }
  0x17   : > { %p129_p3 = pnand %p263_p1, %p128_p2 }
  0x18   : > { %s530_s30 = sand.u32 (!%p129_p3), 1, %s428_s7  }
  0x19   : > { %132 = sbr.rel (%p129_p3) target bundleno = 46 (0x2e), region = 24  ;;  %s135_s2 = scalar_lea.sflag (!%p129_p3), [#allocation3], %s530_s30 }
  0x1a   : > { %s137_s3 = scalar_lea.vmem (!%p129_p3), [#allocation2], %s530_s30 }
  0x1e   : > { %415 = dma.done.wait (%p503_p8), %s135_s2, 16  }
  0x1f   : > { %417 = vsyncadd (%p503_p8), %s135_s2, 4294967280  ;;  %s264_s4 = sshll.u32 %s530_s30, 1  ;;  %s266_s5 = sshll.u32 %s436_s9, 1  ;;  %v331_v0 = vld [vmem:[%s137_s3] ss:$0 sm:$0xff] }
  0x20   : > { %s174_s15 = scalar_lea.hbm %s578_s1, %s266_s5  ;;  %s155_s16 = scalar_lea.vmem [#allocation5], %s264_s4 }
  0x21   : > { %s176_s17 = sshll.u32 %s155_s16, 4  ;;  %s178_s22 = sshll.u32 %s174_s15, 4  ;;  %160 = vst [vmem:[%s155_s16] sm:$0x3] %v331_v0  ;;  %s177_s17 = int_to_ptr.vmem [resolvable:$true] %s176_s17  ;;  %s179_s22 = int_to_ptr.hbm [resolvable:$true] %s178_s22 }
  0x22   : > { %s162_s23 = scalar_lea.sflag [#allocation4], %s530_s30  ;;  %s376_s18 = sshra.s32 %s179_s22, 4  ;;  %s377_s18 = int_to_ptr.hbm [resolvable:$true] %s376_s18 }
  0x23   : > { %s378_s24 = scalar_lea.hbm %s377_s18, 2  ;;  %s382_s26 = scalar_lea.hbm %s578_s1, 4 }
  0x24   : > { %p379_p4 = scmp.ne.s32.totalorder %s377_s18, %s378_s24  ;;  %p383_p7 = scmp.lt.s32.totalorder %s377_s18, %s578_s1 }
  0x25   : > { %p384_p8 = scmp.lt.s32.totalorder %s382_s26, %s378_s24 }
  0x26   : > { %p380_p5 = pnand %p379_p4, %p507_p9 }
  0x27   : > { %p385_p10 = por %p384_p8, %p383_p7 }
  0x28   : > { %p381_p6 = pneg %p380_p5 }
  0x2a   : > { %p386_p13 = pnand %p385_p10, %p381_p6 }
  0x2c   : > { %389 = shalt.err (!%p386_p13)
}
  0x2d   : > { %271 = dma.vmem_to_hbm [thread:$0]  (%p507_p9), %s177_s17, 32, %s179_s22, %s162_s23  }
  0x2e PF: > { %s190_s29 = sand.u32 1, %s424_s6   ;;  %p278_p0 = pnand %p262_p12, %p514_p11 }
  0x2f   : > { %s191_s30 = scalar_lea.sflag [#allocation4], %s190_s29 }
  0x30   : > { %p279_p1 = pneg %p278_p0 }
  0x32   : > { %419 = dma.done.wait (%p279_p1), %s191_s30, 32  }
  0x33   : > { %421 = vsyncadd (%p279_p1), %s191_s30, 4294967264  ;;  %s17_s11 = sadd.s32 1, %s444_s11   ;;  %s583_s6 = smov %s428_s7 }
  0x34   : > { %p14_p2 = scmp.ge.s32.totalorder %s17_s11, 4   ;;  %s584_s7 = smov %s432_s8 }
  0x35   : > { %s585_s8 = smov %s512_s20  ;;  %s586_s9 = smov %s440_s10 }
  0x36   : > { %s587_s10 = smov %s589_s14  ;;  %16 = sbr.rel (!%p14_p2) target bundleno = 6 (0x6), region = 69 }
  0x3b   :  { %197 = vsyncpa [#allocation3], 1 }
  0x3c   :  { %199 = vsyncpa [#allocation3 + $0x1], 1 }
  0x3d   :  { %200 = vsyncpa [#allocation4], 1 }
  0x3e   :  { %202 = vsyncpa [#allocation4 + $0x1], 1 }

</bundles_post_ra>
